<compile_context>
chip_gen: v6e
topology: v6e:2x2x1
jax: 0.10.0
libtpu: 0.0.40
codegen_flags: <defaults>
</compile_context>

<pallas_src>
import functools
import math

import jax
import jax.numpy as jnp
import numpy as np
from jax.experimental import pallas as pl
from jax.experimental.pallas import tpu as pltpu


def _dsconv_kernel(xm_ref, xt_ref, xb_ref, dw_ref, pw_ref, g_ref, b_ref, o_ref,
                   *, TH, W, HL, Cin, Cout, eps):
    # xm_ref : (1, Cin, N)   main strip, rows flattened onto lanes (N = TH*W)
    # xt_ref : (1, Cin, HL)  aligned flat block holding the row above the strip
    # xb_ref : (1, Cin, HL)  aligned flat block holding the row below the strip
    # dw_ref : (Cin, 9)      depthwise weights, [ci, kh*3+kw]
    # pw_ref : (Cin, Cout)   pointwise weights, [ci, co]
    # g_ref/b_ref : (Cout,1) LayerNorm affine
    # o_ref  : (1, Cout, N)
    N = TH * W
    f32 = jnp.float32
    i = pl.program_id(1)
    last = pl.num_programs(1) - 1

    xm = xm_ref[0].astype(f32)                                     # (Cin, N)
    lane = jax.lax.broadcasted_iota(jnp.int32, (Cin, N), 1)
    col = lane % W

    # ---- 1-row halos, positioned at lanes [0, W) (top) / [N-W, N) (bottom) ----
    top_ok = jnp.where(i > 0, 1.0, 0.0).astype(f32)
    bot_ok = jnp.where(i < last, 1.0, 0.0).astype(f32)

    xt = xt_ref[0].astype(f32)                                     # (Cin, HL)
    xb = xb_ref[0].astype(f32)
    if HL != W:
        # halo row is the last / first W lanes of the 128-wide block
        xt = pltpu.roll(xt, W, axis=1)        # row above -> lanes [0, W)
        xb = pltpu.roll(xb, HL - W, axis=1)   # row below -> lanes [HL-W, HL)
    if N > HL:
        zpad = jnp.zeros((Cin, N - HL), f32)
        ht = jnp.concatenate([xt, zpad], axis=1)                   # (Cin, N)
        hb = jnp.concatenate([zpad, xb], axis=1)
    else:
        ht, hb = xt, xb
    ht = ht * top_ok            # zero pad above for the first strip
    hb = hb * bot_ok            # zero pad below for the last strip

    # ---- the three row-shifted planes (dh = -1, 0, +1) via XLU rolls ----
    r_m = jnp.where(lane < W, ht, pltpu.roll(xm, W, axis=1))
    r_p = jnp.where(lane >= N - W, hb, pltpu.roll(xm, N - W, axis=1))

    # ---- depthwise 3x3: 9 taps = column rolls + iota edge masks (VPU + XLU) ----
    ok_l = col != 0             # a column to the left exists
    ok_r = col != (W - 1)       # a column to the right exists
    acc = jnp.zeros((Cin, N), f32)
    for kh, r in enumerate((r_m, xm, r_p)):
        taps = (jnp.where(ok_l, pltpu.roll(r, 1, axis=1), 0.0),     # kw = 0
                r,                                                  # kw = 1
                jnp.where(ok_r, pltpu.roll(r, N - 1, axis=1), 0.0)) # kw = 2
        for kw, t in enumerate(taps):
            idx = 3 * kh + kw
            acc = acc + t * dw_ref[:, idx:idx + 1]                  # (Cin,1) bcast

    # ---- pointwise 1x1 with LayerNorm stats fused into the same pass ----
    if Cin >= 64 and Cout >= 64:
        # MXU path for ConvNeXt-scale channel counts (idle unit at tiny C).
        y = jax.lax.dot_general(pw_ref[...], acc, (((0,), (0,)), ((), ())),
                                preferred_element_type=f32)         # (Cout, N)
        s = jnp.sum(y, axis=0, keepdims=True)
        ss = jnp.sum(y * y, axis=0, keepdims=True)
    else:
        rows = []
        s = jnp.zeros((1, N), f32)
        ss = jnp.zeros((1, N), f32)
        for co in range(Cout):
            yv = jnp.sum(acc * pw_ref[:, co:co + 1], axis=0, keepdims=True)
            rows.append(yv)
            s = s + yv
            ss = ss + yv * yv
        y = jnp.concatenate(rows, axis=0)                            # (Cout, N)

    # ---- LayerNorm2d over channels (biased var, eps), affine, exact GELU ----
    inv_c = 1.0 / Cout
    mean = s * inv_c                                                 # (1, N)
    var = ss * inv_c - mean * mean
    rstd = jax.lax.rsqrt(var + eps)
    yn = (y - mean) * rstd * g_ref[...] + b_ref[...]                 # (Cout, N)
    o_ref[0] = (0.5 * yn * (1.0 + jax.lax.erf(yn * 0.7071067811865476))
                ).astype(o_ref.dtype)


def _pick_block_h(H, W, Cin, Cout, budget_bytes=12 << 20):
    """Rows per strip: H % TH == 0 and TH*W % 128 == 0 (lane-dense flat blocks),
    sized to a per-step budget that is v7x-safe (64 MiB VMEM); >= 2 strips are
    preferred so the pipeline / both TensorCores have work."""
    r0 = 128 // math.gcd(W, 128)
    cand = [d for d in range(r0, H + 1, r0) if H % d == 0]
    if not cand:
        return H
    HL = W if W % 128 == 0 else 128

    def step_bytes(th):
        n = th * W
        dbl = Cin * n + 2 * Cin * HL + Cout * n       # double-buffered in/out blocks
        live = 3 * (Cin + Cout) * n                   # rough in-kernel value footprint
        return 4 * (2 * dbl + live)

    ok = [d for d in cand if step_bytes(d) <= budget_bytes] or [cand[0]]
    multi = [d for d in ok if H // d >= 2]
    return max(multi) if multi else max(ok)


def depthwise_separable_conv(x, dw_w, pw_w, gamma, beta, *, eps=1e-6, block_h=None):
    """x: (B, Cin, H, W) NCHW; dw_w: (Cin,1,3,3); pw_w: (Cout,Cin,1,1);
    gamma/beta: (Cout,).  Returns (B, Cout, H, W) in x.dtype (NCHW)."""
    B, Cin, H, W = x.shape
    K = dw_w.shape[-1]
    Cout = pw_w.shape[0]
    assert K == 3 and dw_w.shape == (Cin, 1, K, K), "specialised for 3x3, padding=1"
    assert pw_w.shape == (Cout, Cin, 1, 1)
    # TODO(synk): W values with 128 % W != 0 and W % 128 != 0 need explicit W tiling.
    assert (128 % W == 0) or (W % 128 == 0)

    HL = W if W % 128 == 0 else 128           # flat halo-block length
    HW = H * W
    TH = block_h if block_h is not None else _pick_block_h(H, W, Cin, Cout)
    assert H % TH == 0 and (TH * W) % HL == 0 and (TH * W) % 128 == 0
    N = TH * W
    nH = H // TH
    NB = N // HL                              # strip length in halo-block units

    xf = x.reshape(B, Cin, HW)                                    # contiguous: free
    dw_mat = dw_w.reshape(Cin, K * K).astype(jnp.float32)         # [ci, kh*3+kw]
    pw_mat = pw_w.reshape(Cout, Cin).T.astype(jnp.float32)        # [ci, co]
    g_col = gamma.reshape(Cout, 1).astype(jnp.float32)
    b_col = beta.reshape(Cout, 1).astype(jnp.float32)

    def main_map(b, i):
        return (b, 0, i)

    def top_map(b, i):   # flat block whose last W lanes are the row above the strip
        return (b, 0, jnp.maximum(i * NB - 1, 0))

    def bot_map(b, i):   # flat block whose first W lanes are the row below the strip
        return (b, 0, jnp.minimum((i + 1) * NB, HW // HL - 1))

    def const_map(b, i):
        return (0, 0)

    kernel = functools.partial(_dsconv_kernel, TH=TH, W=W, HL=HL,
                               Cin=Cin, Cout=Cout, eps=eps)

    flops = 2 * B * HW * Cin * (K * K + Cout) + 10 * B * Cout * HW
    transc = B * HW * (Cout + 1)
    bytes_acc = (x.dtype.itemsize * B * (Cin + Cout) * HW
                 + 8 * B * nH * Cin * HL
                 + 4 * (Cin * K * K + Cin * Cout + 2 * Cout))

    out = pl.pallas_call(
        kernel,
        out_shape=jax.ShapeDtypeStruct((B, Cout, HW), x.dtype),
        grid=(B, nH),
        in_specs=[
            pl.BlockSpec((1, Cin, N), main_map),     # main strip (rows flattened)
            pl.BlockSpec((1, Cin, HL), top_map),     # top halo block
            pl.BlockSpec((1, Cin, HL), bot_map),     # bottom halo block
            pl.BlockSpec((Cin, K * K), const_map),   # depthwise weights
            pl.BlockSpec((Cin, Cout), const_map),    # pointwise weights
            pl.BlockSpec((Cout, 1), const_map),      # LayerNorm gamma
            pl.BlockSpec((Cout, 1), const_map),      # LayerNorm beta
        ],
        out_specs=pl.BlockSpec((1, Cout, N), main_map),
        compiler_params=pltpu.CompilerParams(
            dimension_semantics=("parallel", "parallel"),
            vmem_limit_bytes=48 * 1024 * 1024,
        ),
        cost_estimate=pl.CostEstimate(flops=flops, transcendentals=transc,
                                      bytes_accessed=bytes_acc),
    )(xf, xf, xf, dw_mat, pw_mat, g_col, b_col)

    return out.reshape(B, Cout, H, W)


def _reference(x, dw_w, pw_w, gamma, beta, eps=1e-6):
    """Pure-JAX reference matching the PyTorch module semantics (NCHW, bias=False)."""
    Cin = x.shape[1]
    dn = jax.lax.conv_dimension_numbers(x.shape, dw_w.shape, ("NCHW", "OIHW", "NCHW"))
    out = jax.lax.conv_general_dilated(
        x, dw_w, (1, 1), ((1, 1), (1, 1)),
        dimension_numbers=dn, feature_group_count=Cin)
    dn2 = jax.lax.conv_dimension_numbers(out.shape, pw_w.shape, ("NCHW", "OIHW", "NCHW"))
    out = jax.lax.conv_general_dilated(
        out, pw_w, (1, 1), ((0, 0), (0, 0)), dimension_numbers=dn2)
    mean = out.mean(axis=1, keepdims=True)
    var = ((out - mean) ** 2).mean(axis=1, keepdims=True)
    out = (out - mean) / jnp.sqrt(var + eps)
    out = gamma[None, :, None, None] * out + beta[None, :, None, None]
    return jax.nn.gelu(out, approximate=False)


if __name__ == "__main__":
    B, Cin, Cout, H, W, K = 2, 4, 8, 16, 16, 3

    key = jax.random.PRNGKey(0)
    kx, kd, kp, kg, kb = jax.random.split(key, 5)

    x = jax.random.normal(kx, (B, Cin, H, W), dtype=jnp.float32)
    dw_w = 0.2 * jax.random.normal(kd, (Cin, 1, K, K), dtype=jnp.float32)     # depthwise
    pw_w = 0.2 * jax.random.normal(kp, (Cout, Cin, 1, 1), dtype=jnp.float32)  # pointwise
    gamma = 1.0 + 0.1 * jax.random.normal(kg, (Cout,), dtype=jnp.float32)     # LN weight
    beta = 0.05 * jax.random.normal(kb, (Cout,), dtype=jnp.float32)           # LN bias

    ref = jax.block_until_ready(_reference(x, dw_w, pw_w, gamma, beta))

    # Default tiling (TH=8 -> 2 strips per image: exercises the halo path).
    out = jax.block_until_ready(depthwise_separable_conv(x, dw_w, pw_w, gamma, beta))
    np.testing.assert_allclose(np.asarray(out), np.asarray(ref), rtol=1e-4, atol=1e-4)

    # Single-strip tiling (TH=16: exercises the N > halo-block padding path).
    out1 = jax.block_until_ready(
        depthwise_separable_conv(x, dw_w, pw_w, gamma, beta, block_h=16))
    np.testing.assert_allclose(np.asarray(out1), np.asarray(ref), rtol=1e-4, atol=1e-4)

    print("KERNEL_OK")
</pallas_src>

<mosaic_0001>
module attributes {stable_mosaic.version = 11 : i64} {
  func.func @_dsconv_kernel(%arg0: i32, %arg1: i32, %arg2: memref<1x4x128xf32, #tpu.memory_space<vmem>>, %arg3: memref<1x4x128xf32, #tpu.memory_space<vmem>>, %arg4: memref<1x4x128xf32, #tpu.memory_space<vmem>>, %arg5: memref<4x9xf32, #tpu.memory_space<vmem>>, %arg6: memref<4x8xf32, #tpu.memory_space<vmem>>, %arg7: memref<8x1xf32, #tpu.memory_space<vmem>>, %arg8: memref<8x1xf32, #tpu.memory_space<vmem>>, %arg9: memref<1x8x128xf32, #tpu.memory_space<vmem>>) attributes {dimension_semantics = [#tpu.dimension_semantics<parallel>, #tpu.dimension_semantics<parallel>], iteration_bounds = array<i64: 2, 2>, scalar_prefetch = 0 : i64, scratch_operands = 0 : i64, tpu.core_type = #tpu.core_type<tc>, window_params = [{transform_indices = @transform_0, window_bounds = array<i64: 1, 4, 128>}, {transform_indices = @transform_1, window_bounds = array<i64: 1, 4, 128>}, {transform_indices = @transform_2, window_bounds = array<i64: 1, 4, 128>}, {pipeline_mode = #tpu.pipeline_mode<synchronous>, transform_indices = @transform_3, window_bounds = array<i64: 4, 9>}, {pipeline_mode = #tpu.pipeline_mode<synchronous>, transform_indices = @transform_4, window_bounds = array<i64: 4, 8>}, {pipeline_mode = #tpu.pipeline_mode<synchronous>, transform_indices = @transform_5, window_bounds = array<i64: 8, 1>}, {pipeline_mode = #tpu.pipeline_mode<synchronous>, transform_indices = @transform_6, window_bounds = array<i64: 8, 1>}, {transform_indices = @transform_7, window_bounds = array<i64: 1, 8, 128>}]} {
    %c0 = arith.constant 0 : index
    %c0_0 = arith.constant 0 : index
    %c0_1 = arith.constant 0 : index
    %0 = vector.load %arg2[%c0, %c0_0, %c0_1] : memref<1x4x128xf32, #tpu.memory_space<vmem>>, vector<1x4x128xf32>
    %1 = vector.shape_cast %0 : vector<1x4x128xf32> to vector<4x128xf32>
    %2 = tpu.iota {dimensions = array<i32: 1>} : vector<4x128xi32>
    %c16_i32 = arith.constant 16 : i32
    %c0_i32 = arith.constant 0 : i32
    %3 = arith.cmpi eq, %c16_i32, %c0_i32 : i32
    %c1_i32 = arith.constant 1 : i32
    %4 = arith.select %3, %c1_i32, %c16_i32 : i32
    %5 = vector.broadcast %4 : i32 to vector<4x128xi32>
    %6 = arith.remsi %2, %5 : vector<4x128xi32>
    %c0_i32_2 = arith.constant 0 : i32
    %7 = vector.broadcast %c0_i32_2 : i32 to vector<4x128xi32>
    %8 = arith.cmpi ne, %6, %7 : vector<4x128xi32>
    %c0_i32_3 = arith.constant 0 : i32
    %9 = vector.broadcast %c0_i32_3 : i32 to vector<4x128xi32>
    %10 = arith.cmpi slt, %6, %9 : vector<4x128xi32>
    %c0_i32_4 = arith.constant 0 : i32
    %11 = arith.cmpi slt, %4, %c0_i32_4 : i32
    %12 = vector.broadcast %11 : i1 to vector<4x128xi1>
    %13 = vector.broadcast %12 : vector<4x128xi1> to vector<4x128xi1>
    %14 = arith.xori %10, %13 : vector<4x128xi1>
    %15 = arith.andi %14, %8 : vector<4x128xi1>
    %16 = vector.broadcast %4 : i32 to vector<4x128xi32>
    %17 = arith.addi %6, %16 : vector<4x128xi32>
    %18 = arith.select %15, %17, %6 : vector<4x128xi1>, vector<4x128xi32>
    %c0_i32_5 = arith.constant 0 : i32
    %19 = arith.cmpi sgt, %arg1, %c0_i32_5 : i32
    %cst = arith.constant 1.000000e+00 : f32
    %cst_6 = arith.constant 0.000000e+00 : f32
    %20 = arith.select %19, %cst, %cst_6 : f32
    %c1_i32_7 = arith.constant 1 : i32
    %21 = arith.cmpi slt, %arg1, %c1_i32_7 : i32
    %cst_8 = arith.constant 1.000000e+00 : f32
    %cst_9 = arith.constant 0.000000e+00 : f32
    %22 = arith.select %21, %cst_8, %cst_9 : f32
    %c0_10 = arith.constant 0 : index
    %c0_11 = arith.constant 0 : index
    %c0_12 = arith.constant 0 : index
    %23 = vector.load %arg3[%c0_10, %c0_11, %c0_12] : memref<1x4x128xf32, #tpu.memory_space<vmem>>, vector<1x4x128xf32>
    %24 = vector.shape_cast %23 : vector<1x4x128xf32> to vector<4x128xf32>
    %c0_13 = arith.constant 0 : index
    %c0_14 = arith.constant 0 : index
    %c0_15 = arith.constant 0 : index
    %25 = vector.load %arg4[%c0_13, %c0_14, %c0_15] : memref<1x4x128xf32, #tpu.memory_space<vmem>>, vector<1x4x128xf32>
    %26 = vector.shape_cast %25 : vector<1x4x128xf32> to vector<4x128xf32>
    %c16_i32_16 = arith.constant 16 : i32
    %27 = tpu.dynamic_rotate %24 by %c16_i32_16 dim 1 : vector<4x128xf32>, i32 -> vector<4x128xf32>
    %c112_i32 = arith.constant 112 : i32
    %28 = tpu.dynamic_rotate %26 by %c112_i32 dim 1 : vector<4x128xf32>, i32 -> vector<4x128xf32>
    %29 = vector.broadcast %20 : f32 to vector<4x128xf32>
    %30 = arith.mulf %27, %29 : vector<4x128xf32>
    %31 = vector.broadcast %22 : f32 to vector<4x128xf32>
    %32 = arith.mulf %28, %31 : vector<4x128xf32>
    %c16_i32_17 = arith.constant 16 : i32
    %33 = vector.broadcast %c16_i32_17 : i32 to vector<4x128xi32>
    %34 = arith.cmpi slt, %2, %33 : vector<4x128xi32>
    %c16_i32_18 = arith.constant 16 : i32
    %35 = tpu.dynamic_rotate %1 by %c16_i32_18 dim 1 : vector<4x128xf32>, i32 -> vector<4x128xf32>
    %36 = arith.select %34, %30, %35 : vector<4x128xi1>, vector<4x128xf32>
    %c112_i32_19 = arith.constant 112 : i32
    %37 = vector.broadcast %c112_i32_19 : i32 to vector<4x128xi32>
    %38 = arith.cmpi sge, %2, %37 : vector<4x128xi32>
    %c112_i32_20 = arith.constant 112 : i32
    %39 = tpu.dynamic_rotate %1 by %c112_i32_20 dim 1 : vector<4x128xf32>, i32 -> vector<4x128xf32>
    %40 = arith.select %38, %32, %39 : vector<4x128xi1>, vector<4x128xf32>
    %c0_i32_21 = arith.constant 0 : i32
    %41 = vector.broadcast %c0_i32_21 : i32 to vector<4x128xi32>
    %42 = arith.cmpi ne, %18, %41 : vector<4x128xi32>
    %c15_i32 = arith.constant 15 : i32
    %43 = vector.broadcast %c15_i32 : i32 to vector<4x128xi32>
    %44 = arith.cmpi ne, %18, %43 : vector<4x128xi32>
    %cst_22 = arith.constant 0.000000e+00 : f32
    %45 = vector.broadcast %cst_22 : f32 to vector<4x128xf32>
    %c1_i32_23 = arith.constant 1 : i32
    %46 = tpu.dynamic_rotate %36 by %c1_i32_23 dim 1 : vector<4x128xf32>, i32 -> vector<4x128xf32>
    %cst_24 = arith.constant 0.000000e+00 : f32
    %47 = vector.broadcast %cst_24 : f32 to vector<4x128xf32>
    %48 = arith.select %42, %46, %47 : vector<4x128xi1>, vector<4x128xf32>
    %c127_i32 = arith.constant 127 : i32
    %49 = tpu.dynamic_rotate %36 by %c127_i32 dim 1 : vector<4x128xf32>, i32 -> vector<4x128xf32>
    %cst_25 = arith.constant 0.000000e+00 : f32
    %50 = vector.broadcast %cst_25 : f32 to vector<4x128xf32>
    %51 = arith.select %44, %49, %50 : vector<4x128xi1>, vector<4x128xf32>
    %c0_26 = arith.constant 0 : index
    %c0_27 = arith.constant 0 : index
    %52 = vector.load %arg5[%c0_26, %c0_27] : memref<4x9xf32, #tpu.memory_space<vmem>>, vector<4x1xf32>
    %53 = vector.broadcast %52 : vector<4x1xf32> to vector<4x128xf32>
    %54 = arith.mulf %48, %53 : vector<4x128xf32>
    %55 = arith.addf %45, %54 : vector<4x128xf32>
    %c0_28 = arith.constant 0 : index
    %c1 = arith.constant 1 : index
    %56 = vector.load %arg5[%c0_28, %c1] : memref<4x9xf32, #tpu.memory_space<vmem>>, vector<4x1xf32>
    %57 = vector.broadcast %56 : vector<4x1xf32> to vector<4x128xf32>
    %58 = arith.mulf %36, %57 : vector<4x128xf32>
    %59 = arith.addf %55, %58 : vector<4x128xf32>
    %c0_29 = arith.constant 0 : index
    %c2 = arith.constant 2 : index
    %60 = vector.load %arg5[%c0_29, %c2] : memref<4x9xf32, #tpu.memory_space<vmem>>, vector<4x1xf32>
    %61 = vector.broadcast %60 : vector<4x1xf32> to vector<4x128xf32>
    %62 = arith.mulf %51, %61 : vector<4x128xf32>
    %63 = arith.addf %59, %62 : vector<4x128xf32>
    %c1_i32_30 = arith.constant 1 : i32
    %64 = tpu.dynamic_rotate %1 by %c1_i32_30 dim 1 : vector<4x128xf32>, i32 -> vector<4x128xf32>
    %cst_31 = arith.constant 0.000000e+00 : f32
    %65 = vector.broadcast %cst_31 : f32 to vector<4x128xf32>
    %66 = arith.select %42, %64, %65 : vector<4x128xi1>, vector<4x128xf32>
    %c127_i32_32 = arith.constant 127 : i32
    %67 = tpu.dynamic_rotate %1 by %c127_i32_32 dim 1 : vector<4x128xf32>, i32 -> vector<4x128xf32>
    %cst_33 = arith.constant 0.000000e+00 : f32
    %68 = vector.broadcast %cst_33 : f32 to vector<4x128xf32>
    %69 = arith.select %44, %67, %68 : vector<4x128xi1>, vector<4x128xf32>
    %c0_34 = arith.constant 0 : index
    %c3 = arith.constant 3 : index
    %70 = vector.load %arg5[%c0_34, %c3] : memref<4x9xf32, #tpu.memory_space<vmem>>, vector<4x1xf32>
    %71 = vector.broadcast %70 : vector<4x1xf32> to vector<4x128xf32>
    %72 = arith.mulf %66, %71 : vector<4x128xf32>
    %73 = arith.addf %63, %72 : vector<4x128xf32>
    %c0_35 = arith.constant 0 : index
    %c4 = arith.constant 4 : index
    %74 = vector.load %arg5[%c0_35, %c4] : memref<4x9xf32, #tpu.memory_space<vmem>>, vector<4x1xf32>
    %75 = vector.broadcast %74 : vector<4x1xf32> to vector<4x128xf32>
    %76 = arith.mulf %1, %75 : vector<4x128xf32>
    %77 = arith.addf %73, %76 : vector<4x128xf32>
    %c0_36 = arith.constant 0 : index
    %c5 = arith.constant 5 : index
    %78 = vector.load %arg5[%c0_36, %c5] : memref<4x9xf32, #tpu.memory_space<vmem>>, vector<4x1xf32>
    %79 = vector.broadcast %78 : vector<4x1xf32> to vector<4x128xf32>
    %80 = arith.mulf %69, %79 : vector<4x128xf32>
    %81 = arith.addf %77, %80 : vector<4x128xf32>
    %c1_i32_37 = arith.constant 1 : i32
    %82 = tpu.dynamic_rotate %40 by %c1_i32_37 dim 1 : vector<4x128xf32>, i32 -> vector<4x128xf32>
    %cst_38 = arith.constant 0.000000e+00 : f32
    %83 = vector.broadcast %cst_38 : f32 to vector<4x128xf32>
    %84 = arith.select %42, %82, %83 : vector<4x128xi1>, vector<4x128xf32>
    %c127_i32_39 = arith.constant 127 : i32
    %85 = tpu.dynamic_rotate %40 by %c127_i32_39 dim 1 : vector<4x128xf32>, i32 -> vector<4x128xf32>
    %cst_40 = arith.constant 0.000000e+00 : f32
    %86 = vector.broadcast %cst_40 : f32 to vector<4x128xf32>
    %87 = arith.select %44, %85, %86 : vector<4x128xi1>, vector<4x128xf32>
    %c0_41 = arith.constant 0 : index
    %c6 = arith.constant 6 : index
    %88 = vector.load %arg5[%c0_41, %c6] : memref<4x9xf32, #tpu.memory_space<vmem>>, vector<4x1xf32>
    %89 = vector.broadcast %88 : vector<4x1xf32> to vector<4x128xf32>
    %90 = arith.mulf %84, %89 : vector<4x128xf32>
    %91 = arith.addf %81, %90 : vector<4x128xf32>
    %c0_42 = arith.constant 0 : index
    %c7 = arith.constant 7 : index
    %92 = vector.load %arg5[%c0_42, %c7] : memref<4x9xf32, #tpu.memory_space<vmem>>, vector<4x1xf32>
    %93 = vector.broadcast %92 : vector<4x1xf32> to vector<4x128xf32>
    %94 = arith.mulf %40, %93 : vector<4x128xf32>
    %95 = arith.addf %91, %94 : vector<4x128xf32>
    %c0_43 = arith.constant 0 : index
    %c8 = arith.constant 8 : index
    %96 = vector.load %arg5[%c0_43, %c8] : memref<4x9xf32, #tpu.memory_space<vmem>>, vector<4x1xf32>
    %97 = vector.broadcast %96 : vector<4x1xf32> to vector<4x128xf32>
    %98 = arith.mulf %87, %97 : vector<4x128xf32>
    %99 = arith.addf %95, %98 : vector<4x128xf32>
    %cst_44 = arith.constant 0.000000e+00 : f32
    %100 = vector.broadcast %cst_44 : f32 to vector<1x128xf32>
    %cst_45 = arith.constant 0.000000e+00 : f32
    %101 = vector.broadcast %cst_45 : f32 to vector<1x128xf32>
    %c0_46 = arith.constant 0 : index
    %c0_47 = arith.constant 0 : index
    %102 = vector.load %arg6[%c0_46, %c0_47] : memref<4x8xf32, #tpu.memory_space<vmem>>, vector<4x1xf32>
    %103 = vector.broadcast %102 : vector<4x1xf32> to vector<4x128xf32>
    %104 = arith.mulf %99, %103 : vector<4x128xf32>
    %cst_48 = arith.constant dense<0.000000e+00> : vector<128xf32>
    %105 = vector.multi_reduction <add>, %104, %cst_48 [0] : vector<4x128xf32> to vector<128xf32>
    %106 = vector.shape_cast %105 : vector<128xf32> to vector<1x128xf32>
    %107 = arith.addf %100, %106 : vector<1x128xf32>
    %108 = arith.mulf %106, %106 : vector<1x128xf32>
    %109 = arith.addf %101, %108 : vector<1x128xf32>
    %c0_49 = arith.constant 0 : index
    %c1_50 = arith.constant 1 : index
    %110 = vector.load %arg6[%c0_49, %c1_50] : memref<4x8xf32, #tpu.memory_space<vmem>>, vector<4x1xf32>
    %111 = vector.broadcast %110 : vector<4x1xf32> to vector<4x128xf32>
    %112 = arith.mulf %99, %111 : vector<4x128xf32>
    %cst_51 = arith.constant dense<0.000000e+00> : vector<128xf32>
    %113 = vector.multi_reduction <add>, %112, %cst_51 [0] : vector<4x128xf32> to vector<128xf32>
    %114 = vector.shape_cast %113 : vector<128xf32> to vector<1x128xf32>
    %115 = arith.addf %107, %114 : vector<1x128xf32>
    %116 = arith.mulf %114, %114 : vector<1x128xf32>
    %117 = arith.addf %109, %116 : vector<1x128xf32>
    %c0_52 = arith.constant 0 : index
    %c2_53 = arith.constant 2 : index
    %118 = vector.load %arg6[%c0_52, %c2_53] : memref<4x8xf32, #tpu.memory_space<vmem>>, vector<4x1xf32>
    %119 = vector.broadcast %118 : vector<4x1xf32> to vector<4x128xf32>
    %120 = arith.mulf %99, %119 : vector<4x128xf32>
    %cst_54 = arith.constant dense<0.000000e+00> : vector<128xf32>
    %121 = vector.multi_reduction <add>, %120, %cst_54 [0] : vector<4x128xf32> to vector<128xf32>
    %122 = vector.shape_cast %121 : vector<128xf32> to vector<1x128xf32>
    %123 = arith.addf %115, %122 : vector<1x128xf32>
    %124 = arith.mulf %122, %122 : vector<1x128xf32>
    %125 = arith.addf %117, %124 : vector<1x128xf32>
    %c0_55 = arith.constant 0 : index
    %c3_56 = arith.constant 3 : index
    %126 = vector.load %arg6[%c0_55, %c3_56] : memref<4x8xf32, #tpu.memory_space<vmem>>, vector<4x1xf32>
    %127 = vector.broadcast %126 : vector<4x1xf32> to vector<4x128xf32>
    %128 = arith.mulf %99, %127 : vector<4x128xf32>
    %cst_57 = arith.constant dense<0.000000e+00> : vector<128xf32>
    %129 = vector.multi_reduction <add>, %128, %cst_57 [0] : vector<4x128xf32> to vector<128xf32>
    %130 = vector.shape_cast %129 : vector<128xf32> to vector<1x128xf32>
    %131 = arith.addf %123, %130 : vector<1x128xf32>
    %132 = arith.mulf %130, %130 : vector<1x128xf32>
    %133 = arith.addf %125, %132 : vector<1x128xf32>
    %c0_58 = arith.constant 0 : index
    %c4_59 = arith.constant 4 : index
    %134 = vector.load %arg6[%c0_58, %c4_59] : memref<4x8xf32, #tpu.memory_space<vmem>>, vector<4x1xf32>
    %135 = vector.broadcast %134 : vector<4x1xf32> to vector<4x128xf32>
    %136 = arith.mulf %99, %135 : vector<4x128xf32>
    %cst_60 = arith.constant dense<0.000000e+00> : vector<128xf32>
    %137 = vector.multi_reduction <add>, %136, %cst_60 [0] : vector<4x128xf32> to vector<128xf32>
    %138 = vector.shape_cast %137 : vector<128xf32> to vector<1x128xf32>
    %139 = arith.addf %131, %138 : vector<1x128xf32>
    %140 = arith.mulf %138, %138 : vector<1x128xf32>
    %141 = arith.addf %133, %140 : vector<1x128xf32>
    %c0_61 = arith.constant 0 : index
    %c5_62 = arith.constant 5 : index
    %142 = vector.load %arg6[%c0_61, %c5_62] : memref<4x8xf32, #tpu.memory_space<vmem>>, vector<4x1xf32>
    %143 = vector.broadcast %142 : vector<4x1xf32> to vector<4x128xf32>
    %144 = arith.mulf %99, %143 : vector<4x128xf32>
    %cst_63 = arith.constant dense<0.000000e+00> : vector<128xf32>
    %145 = vector.multi_reduction <add>, %144, %cst_63 [0] : vector<4x128xf32> to vector<128xf32>
    %146 = vector.shape_cast %145 : vector<128xf32> to vector<1x128xf32>
    %147 = arith.addf %139, %146 : vector<1x128xf32>
    %148 = arith.mulf %146, %146 : vector<1x128xf32>
    %149 = arith.addf %141, %148 : vector<1x128xf32>
    %c0_64 = arith.constant 0 : index
    %c6_65 = arith.constant 6 : index
    %150 = vector.load %arg6[%c0_64, %c6_65] : memref<4x8xf32, #tpu.memory_space<vmem>>, vector<4x1xf32>
    %151 = vector.broadcast %150 : vector<4x1xf32> to vector<4x128xf32>
    %152 = arith.mulf %99, %151 : vector<4x128xf32>
    %cst_66 = arith.constant dense<0.000000e+00> : vector<128xf32>
    %153 = vector.multi_reduction <add>, %152, %cst_66 [0] : vector<4x128xf32> to vector<128xf32>
    %154 = vector.shape_cast %153 : vector<128xf32> to vector<1x128xf32>
    %155 = arith.addf %147, %154 : vector<1x128xf32>
    %156 = arith.mulf %154, %154 : vector<1x128xf32>
    %157 = arith.addf %149, %156 : vector<1x128xf32>
    %c0_67 = arith.constant 0 : index
    %c7_68 = arith.constant 7 : index
    %158 = vector.load %arg6[%c0_67, %c7_68] : memref<4x8xf32, #tpu.memory_space<vmem>>, vector<4x1xf32>
    %159 = vector.broadcast %158 : vector<4x1xf32> to vector<4x128xf32>
    %160 = arith.mulf %99, %159 : vector<4x128xf32>
    %cst_69 = arith.constant dense<0.000000e+00> : vector<128xf32>
    %161 = vector.multi_reduction <add>, %160, %cst_69 [0] : vector<4x128xf32> to vector<128xf32>
    %162 = vector.shape_cast %161 : vector<128xf32> to vector<1x128xf32>
    %163 = arith.addf %155, %162 : vector<1x128xf32>
    %164 = arith.mulf %162, %162 : vector<1x128xf32>
    %165 = arith.addf %157, %164 : vector<1x128xf32>
    %166 = tpu.concatenate %106, %114, %122, %130, %138, %146, %154, %162 in 0 : vector<1x128xf32>, vector<1x128xf32>, vector<1x128xf32>, vector<1x128xf32>, vector<1x128xf32>, vector<1x128xf32>, vector<1x128xf32>, vector<1x128xf32> -> vector<8x128xf32>
    %cst_70 = arith.constant 1.250000e-01 : f32
    %167 = vector.broadcast %cst_70 : f32 to vector<1x128xf32>
    %168 = arith.mulf %163, %167 : vector<1x128xf32>
    %cst_71 = arith.constant 1.250000e-01 : f32
    %169 = vector.broadcast %cst_71 : f32 to vector<1x128xf32>
    %170 = arith.mulf %165, %169 : vector<1x128xf32>
    %171 = arith.mulf %168, %168 : vector<1x128xf32>
    %172 = arith.subf %170, %171 : vector<1x128xf32>
    %cst_72 = arith.constant 9.99999997E-7 : f32
    %173 = vector.broadcast %cst_72 : f32 to vector<1x128xf32>
    %174 = arith.addf %172, %173 : vector<1x128xf32>
    %175 = math.rsqrt %174 : vector<1x128xf32>
    %176 = vector.broadcast %168 : vector<1x128xf32> to vector<8x128xf32>
    %177 = arith.subf %166, %176 : vector<8x128xf32>
    %178 = vector.broadcast %175 : vector<1x128xf32> to vector<8x128xf32>
    %179 = arith.mulf %177, %178 : vector<8x128xf32>
    %c0_73 = arith.constant 0 : index
    %c0_74 = arith.constant 0 : index
    %180 = vector.load %arg7[%c0_73, %c0_74] : memref<8x1xf32, #tpu.memory_space<vmem>>, vector<8x1xf32>
    %181 = vector.broadcast %180 : vector<8x1xf32> to vector<8x128xf32>
    %182 = arith.mulf %179, %181 : vector<8x128xf32>
    %c0_75 = arith.constant 0 : index
    %c0_76 = arith.constant 0 : index
    %183 = vector.load %arg8[%c0_75, %c0_76] : memref<8x1xf32, #tpu.memory_space<vmem>>, vector<8x1xf32>
    %184 = vector.broadcast %183 : vector<8x1xf32> to vector<8x128xf32>
    %185 = arith.addf %182, %184 : vector<8x128xf32>
    %cst_77 = arith.constant 5.000000e-01 : f32
    %186 = vector.broadcast %cst_77 : f32 to vector<8x128xf32>
    %187 = arith.mulf %186, %185 : vector<8x128xf32>
    %cst_78 = arith.constant 0.707106769 : f32
    %188 = vector.broadcast %cst_78 : f32 to vector<8x128xf32>
    %189 = arith.mulf %185, %188 : vector<8x128xf32>
    %190 = math.erf %189 : vector<8x128xf32>
    %cst_79 = arith.constant 1.000000e+00 : f32
    %191 = vector.broadcast %cst_79 : f32 to vector<8x128xf32>
    %192 = arith.addf %191, %190 : vector<8x128xf32>
    %193 = arith.mulf %187, %192 : vector<8x128xf32>
    %c0_80 = arith.constant 0 : index
    %c0_81 = arith.constant 0 : index
    %c0_82 = arith.constant 0 : index
    %194 = vector.load %arg9[%c0_80, %c0_81, %c0_82] : memref<1x8x128xf32, #tpu.memory_space<vmem>>, vector<1x8x128xf32>
    %195 = vector.shape_cast %194 : vector<1x8x128xf32> to vector<8x128xf32>
    %196 = vector.shape_cast %193 : vector<8x128xf32> to vector<1x8x128xf32>
    tpu.vector_store %arg9[%c0_80, %c0_81, %c0_82], %196 {strides = array<i32>} : memref<1x8x128xf32, #tpu.memory_space<vmem>>, vector<1x8x128xf32>,
    return
  }
  func.func @transform_0(%arg0: i32, %arg1: i32) -> (i32, i32, i32) {
    %c0_i32 = arith.constant 0 : i32
    %c0_i32_0 = arith.constant 0 : i32
    return %arg0, %c0_i32, %arg1 : i32, i32, i32
  }
  func.func @transform_1(%arg0: i32, %arg1: i32) -> (i32, i32, i32) {
    %c1_i32 = arith.constant 1 : i32
    %0 = arith.muli %arg1, %c1_i32 : i32
    %c1_i32_0 = arith.constant 1 : i32
    %1 = arith.subi %0, %c1_i32_0 : i32
    %c0_i32 = arith.constant 0 : i32
    %2 = arith.maxsi %1, %c0_i32 : i32
    %c0_i32_1 = arith.constant 0 : i32
    %c0_i32_2 = arith.constant 0 : i32
    return %arg0, %c0_i32_1, %2 : i32, i32, i32
  }
  func.func @transform_2(%arg0: i32, %arg1: i32) -> (i32, i32, i32) {
    %c1_i32 = arith.constant 1 : i32
    %0 = arith.addi %arg1, %c1_i32 : i32
    %c1_i32_0 = arith.constant 1 : i32
    %1 = arith.muli %0, %c1_i32_0 : i32
    %c1_i32_1 = arith.constant 1 : i32
    %2 = arith.minsi %1, %c1_i32_1 : i32
    %c0_i32 = arith.constant 0 : i32
    %c0_i32_2 = arith.constant 0 : i32
    return %arg0, %c0_i32, %2 : i32, i32, i32
  }
  func.func @transform_3(%arg0: i32, %arg1: i32) -> (i32, i32) {
    %c0_i32 = arith.constant 0 : i32
    %c0_i32_0 = arith.constant 0 : i32
    %c0_i32_1 = arith.constant 0 : i32
    return %c0_i32, %c0_i32_0 : i32, i32
  }
  func.func @transform_4(%arg0: i32, %arg1: i32) -> (i32, i32) {
    %c0_i32 = arith.constant 0 : i32
    %c0_i32_0 = arith.constant 0 : i32
    %c0_i32_1 = arith.constant 0 : i32
    return %c0_i32, %c0_i32_0 : i32, i32
  }
  func.func @transform_5(%arg0: i32, %arg1: i32) -> (i32, i32) {
    %c0_i32 = arith.constant 0 : i32
    %c0_i32_0 = arith.constant 0 : i32
    %c0_i32_1 = arith.constant 0 : i32
    return %c0_i32, %c0_i32_0 : i32, i32
  }
  func.func @transform_6(%arg0: i32, %arg1: i32) -> (i32, i32) {
    %c0_i32 = arith.constant 0 : i32
    %c0_i32_0 = arith.constant 0 : i32
    %c0_i32_1 = arith.constant 0 : i32
    return %c0_i32, %c0_i32_0 : i32, i32
  }
  func.func @transform_7(%arg0: i32, %arg1: i32) -> (i32, i32, i32) {
    %c0_i32 = arith.constant 0 : i32
    %c0_i32_0 = arith.constant 0 : i32
    return %arg0, %c0_i32, %arg1 : i32, i32, i32
  }
}

</mosaic_0001>

<bundles_post_ra>
// kernel: tpu_custom_call.1
= control target key start
LH: loop header
LB: loop body
LE: loop exit
PB: predicated region body
PF: predicated region fallthrough
CT: control target
= control target key end

     0   :  { %s1635_s0 = inlined_call_operand.vmem [shape: f32[2,4,256], index: 0, kind: input, shape index: {}]   ;;  %s1636_s1 = inlined_call_operand.hbm [shape: f32[2,4,256], index: 1, kind: input, shape index: {}]   ;;  %s1637_s2 = inlined_call_operand.hbm [shape: f32[2,4,256], index: 2, kind: input, shape index: {}]   ;;  %s1638_s3 = inlined_call_operand.vmem [shape: f32[4,9], index: 3, kind: input, shape index: {}]   ;;  %s1639_s4 = inlined_call_operand.vmem [shape: f32[4,8], index: 4, kind: input, shape index: {}]   ;;  %s1640_s5 = inlined_call_operand.vmem [shape: f32[8,1], index: 5, kind: input, shape index: {}]   ;;  %s1641_s6 = inlined_call_operand.vmem [shape: f32[8,1], index: 6, kind: input, shape index: {}]   ;;  %s1642_s7 = inlined_call_operand.hbm [shape: f32[2,8,256], index: 7, kind: output, shape index: {}]  }
   0x1   :  { %1657 = sst [smem:[#allocation19_spill]] %s1636_s1 }
   0x2   :  { %1658 = sst [smem:[#allocation20_spill]] %s1639_s4 }
   0x3   :  { %1659 = sst [smem:[#allocation21_spill]] %s1640_s5 }
   0x4   :  { %1660 = sst [smem:[#allocation22_spill]] %s1641_s6 }
   0x5   :  { %1661 = sst [smem:[#allocation23_spill]] %s1642_s7 }
   0x6   :  { %12 = vsyncpa [#allocation3], 0 }
   0x7   :  { %14 = vsyncpa [#allocation3 + $0x1], 0 }
   0x8   :  { %15 = vsyncpa [#allocation6], 0 }
   0x9   :  { %17 = vsyncpa [#allocation6 + $0x1], 0 }
   0xa   :  { %18 = vsyncpa [#allocation4], 0 }
   0xb   :  { %20 = vsyncpa [#allocation4 + $0x1], 0  ;;  %s1286_s24 = smov 0   ;;  %s1288_s25 = smov 0  }
   0xc   :  { %s1290_s26 = smov 0   ;;  %s1292_s27 = smov 0  }
   0xd   :  { %s1294_s28 = smov 0   ;;  %s1296_s29 = smov 0  }
   0xe   :  { %s1298_s30 = smov 0   ;;  %s1300_s8 = smov 0  }
   0xf   :  { %s1302_s9 = smov 0   ;;  %s1304_s10 = smov 0  }
  0x10   :  { %s1306_s11 = smov 0   ;;  %s1308_s12 = smov 0  }
  0x11   :  { %s1310_s13 = smov 0   ;;  %s1312_s14 = smov 0  }
  0x12 LB: > { %1662 = sst [smem:[#allocation11_spill]] %s1184_s26  ;;  %s829_s15 = sadd.s32 4294967295, %s1228_s14   ;;  %s1228_s14 = sphi %s1312_s14, %s26_s14   ;;  %s1224_s13 = sphi %s1310_s13, %s1716_s13   ;;  %s1220_s12 = sphi %s1308_s12, %s1706_s12   ;;  %s1216_s11 = sphi %s1306_s11, %s1715_s11   ;;  %s1212_s10 = sphi %s1304_s10, %s1705_s10   ;;  %s1208_s9 = sphi %s1302_s9, %s1704_s9   ;;  %s1204_s8 = sphi %s1300_s8, %s1714_s8   ;;  %s1200_s30 = sphi %s1298_s30, %s1713_s30   ;;  %s1196_s29 = sphi %s1296_s29, %s1712_s29   ;;  %s1192_s28 = sphi %s1294_s28, %s1711_s28   ;;  %s1188_s27 = sphi %s1292_s27, %s1710_s27   ;;  %s1184_s26 = sphi %s1290_s26, %s1702_s26   ;;  %s1180_s25 = sphi %s1288_s25, %s1709_s25   ;;  %s1176_s24 = sphi %s1286_s24, %s1708_s24  }
  0x13   : > { %1663 = sst [smem:[#allocation12_spill]] %s1208_s9  ;;  %s830_s16 = sadd.s32 4294967294, %s1228_s14  }
  0x14   : > { %1664 = sst [smem:[#allocation13_spill]] %s1220_s12  ;;  %s35_s17 = sadd.s32 1, %s1220_s12 }
  0x15   : > { %s38_s18 = sadd.s32 1, %s1224_s13  ;;  %p36_p0 = scmp.ge.s32.totalorder %s35_s17, 2 }
  0x16   : > { %s81_s19 = sadd.s32 1, %s1208_s9  ;;  %p88_p2 = scmp.ne.s32.totalorder %s1208_s9, %s1204_s8 }
  0x17   : > { %s1718_s17 = smov (%p36_p0, %s35_s17), 0  ;;  %s1720_s18 = smov (!%p36_p0, %s38_s18), %s1224_s13 }
  0x18   : > { %1665 = sst [smem:[#allocation14_spill]] %s1718_s17  ;;  %p40_p1 = scmp.ge.s32.totalorder %s1720_s18, 2 }
  0x19   : > { %p1650_p3 = scmp.eq.s32.totalorder %s1228_s14, 0  ;;  %p94_p4 = scmp.ne.s32.totalorder %s1204_s8, %s1200_s30 }
  0x1a   : > { %s1722_s18 = smov (%p40_p1, %s1720_s18), 0  ;;  %p1379_p7 = scmp.eq.s32.totalorder %s829_s15, 0 }
  0x1b   : > { %1666 = sst [smem:[#allocation15_spill]] %s1722_s18  ;;  %s1368_s20 = ssub.s32 %s1224_s13, %s1722_s18 }
  0x1c   : > { %p1374_p5 = por %p1650_p3, %p88_p2  ;;  %p1649_p6 = scmp.eq.s32.totalorder %s1368_s20, 0 }
  0x1d   : > { %s1668_s22 = scalar_select %p1379_p7, 1, 0 }
  0x1e   : > { %s223_s23 = ssub.s32 %s1220_s12, %s1718_s17  ;;  %s227_s18 = sadd.s32 1, %s1184_s26 }
  0x1f   : > { %s1389_s7 = scalar_select %p1649_p6, %s1208_s9, %s81_s19  }
  0x20   : > { %p1393_p8 = por %p1379_p7, %p94_p4  ;;  %s224_s6 = sor.u32 %s223_s23, %s1368_s20 }
  0x21   : > { %1669 = sst [smem:[#allocation16_spill]] %s1389_s7  ;;  %p225_p9 = scmp.eq.s32.totalorder %s224_s6, 0 }
  0x22   : > { %s1670_s30 = scalar_select %p1393_p8, 1, 0 }
  0x23   : > { %p237_p10 = scmp.ne.s32.totalorder %s1184_s26, %s1180_s25  ;;  %p238_p11 = scmp.eq.s32.totalorder %s829_s15, 3 }
  0x24   : > { %p243_p12 = scmp.ne.s32.totalorder %s1180_s25, %s1176_s24  ;;  %p244_p0 = scmp.eq.s32.totalorder %s830_s16, 3 }
  0x25   : > { %s1403_s17 = scalar_select %p225_p9, %s1184_s26, %s227_s18  }
  0x26   : > { %p1405_p13 = por %p238_p11, %p237_p10  ;;  %p1651_p1 = scmp.lt.s32.totalorder %s1228_s14, 4 }
  0x27   : > { %1671 = sst [smem:[#allocation17_spill]] %s1403_s17  ;;  %p1410_p2 = por %p244_p0, %p243_p12 }
  0x28   : > { %s1672_s19 = scalar_select %p1405_p13, 1, 0 }
  0x29   : > { %s1673_s12 = scalar_select %p1410_p2, 1, 0 }
  0x2a   : > { %s287_s6 = sand.u32 1, %s1208_s9   ;;  %s1170_s4 = sshll.u32 %s1224_s13, 7 }
  0x2b   : > { %1674 = sst [smem:[#allocation18_spill]] %s1673_s12  ;;  %s835_s23 = sshll.u32 %s287_s6, 2 }
  0x2c   : > { %s291_s7 = scalar_lea.vmem [#allocation2], %s835_s23  ;;  %s1675_s1 = sld [smem:[#allocation19_spill]] }
  0x2d   : > { %s303_s5 = sshll.u32 %s291_s7, 4  ;;  %p1425_p4 = pnand %p1651_p1, %p1374_p5  ;;  %s304_s5 = int_to_ptr.vmem [resolvable:$true] %s303_s5 }
  0x2e   : > { %s288_s9 = scalar_lea.sflag [#allocation3], %s287_s6 }
  0x2f   : > { %p1022_p12 = pneg %p1425_p4 }
  0x32   : > { %s301_s17 = scalar_lea.hbm %s1675_s1, %s1170_s4 }
  0x33   : > { %s1020_s26 = scalar_lea.hbm %s301_s17, 64  ;;  %p1026_p3 = scmp.lt.s32.totalorder %s301_s17, %s1675_s1 }
  0x34   : > { %p1021_p11 = scmp.ne.s32.totalorder %s301_s17, %s1020_s26 }
  0x36   : > { %p1023_p0 = pnand %p1022_p12, %p1021_p11 }
  0x38   : > { %p1024_p6 = pneg %p1023_p0 }
  0x3a   : > { %p1029_p2 = pnand %p1026_p3, %p1024_p6 }
  0x3c   : > { %1032 = shalt.err (!%p1029_p2)
}
  0x3d   : > { %s1033_s21 = scalar_lea.vmem %s304_s5, 64  ;;  %s1230_s15 = smov [#allocation2]  }
  0x3e   : > { %p1034_p5 = scmp.ne.s32.totalorder %s304_s5, %s1033_s21  ;;  %s1038_s18 = sshll.u32 %s1230_s15, 4  ;;  %s1039_s18 = int_to_ptr.vmem [resolvable:$false] %s1038_s18 }
  0x3f   : > { %s1040_s6 = scalar_lea.vmem %s1039_s18, 128  ;;  %p1041_p9 = scmp.lt.s32.totalorder %s304_s5, %s1039_s18 }
  0x40   : > { %p1036_p1 = pnand %p1034_p5, %p1022_p12  ;;  %p1042_p10 = scmp.lt.s32.totalorder %s1040_s6, %s1033_s21 }
  0x42   : > { %p1037_p13 = pneg %p1036_p1  ;;  %p1043_p8 = por %p1042_p10, %p1041_p9 }
  0x44   : > { %p1044_p7 = pnand %p1043_p8, %p1037_p13 }
  0x46   : > { %1047 = shalt.err (!%p1044_p7)
}
  0x47   : > { %862 = dma.hbm_to_vmem [thread:$0]  (!%p1425_p4), %s301_s17, 64, %s304_s5, %s288_s9  }
  0x48   : > { %p1677_p3 = scmp.lt.s32.totalorder %s1228_s14, 5  ;;  %p1678_p6 = scmp.ge.s32.totalorder %s1228_s14, 1 }
  0x49   : > { %p122_p8 = scmp.ne.s32.totalorder %s1196_s29, %s1192_s28  ;;  %p128_p13 = scmp.ne.s32.totalorder %s1192_s28, %s1188_s27 }
  0x4a   : > { %p1442_p7 = pnand %p1678_p6, %p1677_p3  ;;  %s310_s16 = sand.u32 1, %s1196_s29  }
  0x4b   : > { %s115_s7 = sadd.s32 1, %s1196_s29  ;;  %p1680_p1 = scmp.ne.s32.totalorder %s1668_s22, 0 }
  0x4c   : > { %p1682_p9 = scmp.eq.s32.totalorder %s1228_s14, 0  ;;  %s839_s21 = sshll.u32 %s310_s16, 2 }
  0x4d   : > { %p1454_p2 = por %p128_p13, %p1680_p1  ;;  %p1683_p11 = scmp.eq.s32.totalorder %s1368_s20, 0 }
  0x4e   : > { %p124_p10 = por %p122_p8, %p1682_p9  ;;  %s1172_s9 = sadd.s32 64, %s1170_s4 }
  0x4f   : > { %s1681_s23 = scalar_select %p1454_p2, 1, 0 }
  0x50   : > { %s1463_s5 = scalar_select %p1683_p11, %s1196_s29, %s115_s7  }
  0x51   : > { %s314_s17 = scalar_lea.vmem [#allocation5], %s839_s21  ;;  %s324_s27 = scalar_lea.hbm %s1637_s2, %s1172_s9 }
  0x52   : > { %s326_s15 = sshll.u32 %s314_s17, 4  ;;  %p1684_p4 = scmp.lt.s32.totalorder %s1228_s14, 4  ;;  %s327_s15 = int_to_ptr.vmem [resolvable:$true] %s326_s15 }
  0x53   : > { %s311_s1 = scalar_lea.sflag [#allocation6], %s310_s16  ;;  %s1048_s12 = scalar_lea.hbm %s324_s27, 64 }
  0x54   : > { %p1472_p12 = pnand %p1684_p4, %p124_p10  ;;  %p1049_p0 = scmp.ne.s32.totalorder %s324_s27, %s1048_s12 }
  0x55   : > { %s1053_s7 = scalar_lea.hbm %s1637_s2, 256 }
  0x56   : > { %p1050_p5 = pneg %p1472_p12  ;;  %p1055_p8 = scmp.lt.s32.totalorder %s1053_s7, %s1048_s12 }
  0x58   : > { %p1051_p3 = pnand %p1050_p5, %p1049_p0 }
  0x5a   : > { %p1052_p6 = pneg %p1051_p3 }
  0x5c   : > { %p1057_p13 = pnand %p1055_p8, %p1052_p6 }
  0x5e   : > { %1060 = shalt.err (!%p1057_p13)
}
  0x5f   : > { %s1061_s21 = scalar_lea.vmem %s327_s15, 64  ;;  %s1231_s9 = smov [#allocation5]  }
  0x60   : > { %p1062_p1 = scmp.ne.s32.totalorder %s327_s15, %s1061_s21  ;;  %s1066_s17 = sshll.u32 %s1231_s9, 4  ;;  %s1067_s17 = int_to_ptr.vmem [resolvable:$false] %s1066_s17 }
  0x61   : > { %s1068_s16 = scalar_lea.vmem %s1067_s17, 128  ;;  %p1069_p11 = scmp.lt.s32.totalorder %s327_s15, %s1067_s17 }
  0x62   : > { %p1064_p9 = pnand %p1062_p1, %p1050_p5  ;;  %p1070_p4 = scmp.lt.s32.totalorder %s1068_s16, %s1061_s21 }
  0x64   : > { %p1065_p10 = pneg %p1064_p9  ;;  %p1071_p2 = por %p1070_p4, %p1069_p11 }
  0x66   : > { %p1072_p0 = pnand %p1071_p2, %p1065_p10 }
  0x68   : > { %1075 = shalt.err (!%p1072_p0)
}
  0x69   : > { %865 = dma.hbm_to_vmem [thread:$0]  (!%p1472_p12), %s324_s27, 64, %s327_s15, %s311_s1  }
  0x6a   : > { %335 = sbr.rel (%p1442_p7) target bundleno = 477 (0x1dd), region = 48  ;;  %s337_s12 = sand.u32 (!%p1442_p7), 1, %s1204_s8  }
  0x6b   : > { %s843_s18 = sshll.u32 (!%p1442_p7), %s337_s12, 2  ;;  %s338_s6 = scalar_lea.sflag (!%p1442_p7), [#allocation3], %s337_s12 }
  0x6c   : > { %s341_s4 = scalar_lea.vmem (!%p1442_p7), [#allocation2], %s843_s18  ;;  %p1686_p5 = scmp.ne.s32.totalorder (!%p1442_p7), %s1670_s30, 0 }
  0x6f   : > { %1159 = dma.done.wait (%p1686_p5), %s338_s6, 64  }
  0x70   : > { %1161 = vsyncadd (%p1686_p5), %s338_s6, 4294967232  ;;  %s346_s20 = sand.u32 1, %s1192_s28   ;;  %p1687_p2 = scmp.ne.s32.totalorder %s1681_s23, 0 }
  0x71   : > { %s844_s7 = sshll.u32 %s346_s20, 2  ;;  %s347_s22 = scalar_lea.sflag [#allocation6], %s346_s20 }
  0x72   : > { %s350_s1 = scalar_lea.vmem [#allocation5], %s844_s7 }
  0x73   : > { %1163 = dma.done.wait (%p1687_p2), %s347_s22, 64  }
  0x74   : > { %1165 = vsyncadd (%p1687_p2), %s347_s22, 4294967232  ;;  %p394_p7 = scmp.lt.s32.totalorder %s1216_s11, 1  ;;  %p396_p12 = scmp.lt.s32.totalorder %s1212_s10, 1  ;;  %v1232_v0 = vmov 1   ;;  %v1233_v1 = vmov 0   ;;  %v1236_v6 = vmov 2   ;;  %v409_v16 = vlaneseq }
  0x75   : > { %998 = vset.pattern.permute.xlu1 %v1232_v0  ;;  %997 = vset.pattern.permute.xlu0 %v1233_v1  ;;  %v428_v2 = vld [vmem:[%s350_s1] sm:$0xf]  ;;  %v427_v3 = vld [vmem:[%s341_s4] sm:$0xf]  ;;  %s1234_s21 = smov 112   ;;  %s1235_s9 = smov 16  }
  0x76   : > { %s395_s30 = scalar_select %p394_p7, %s1216_s11, 1  ;;  %431 = vrot.lane.b32.xlu1 %v428_v2, %s1234_s21  ;;  %429 = vrot.lane.b32.xlu0 %v427_v3, %s1235_s9  ;;  %v453_v5 = vld [vmem:[%s1638_s3] sm:$0xf]  ;;  %v1238_v7 = vmov 6   ;;  %v1239_v8 = vmov 3   ;;  %v1240_v9 = vmov 4  }
  0x77   : > { %s397_s26 = scalar_select %p396_p12, %s1212_s10, 1  ;;  %v1241_v10 = vmov 5   ;;  %v1243_v11 = vmov 7   ;;  %v1244_v12 = vmov 8   ;;  %v410_v17 = vand.u32 127, %v409_v16 }
  0x78   : > { %s846_s15 = sshll.u32 %s395_s30, 1  ;;  %s1237_s4 = smov 1   ;;  %vm528_vm4 = vcmask 1043456   ;;  %vm644_vm5 = vcmask 1040384   ;;  %vm646_vm6 = vcmask 1041408   ;;  %vm648_vm7 = vcmask 1042432  }
  0x79   : > { %s399_s27 = sadd.s32 %s846_s15, %s397_s26  ;;  %s1242_s20 = smov 127   ;;  %vm437_vm0 = vcmp.lt.s32.totalorder %v410_v17, 16  ;;  %vm441_vm1 = vcmp.ge.s32.totalorder %v410_v17, 112  ;;  %v415_v38 = vand.u32 15, %v410_v17  ;;  %vm651_vm8 = vcmask 1044480  }
  0x7a   : > { %s847_s23 = sshll.u32 %s399_s27, 2  ;;  %s1688_s1 = sld [smem:[#allocation20_spill]]  ;;  %vm653_vm9 = vcmask 1045504   ;;  %vm655_vm10 = vcmask 1046528  }
  0x7b   : > { %s401_s12 = scalar_lea.vmem %s1635_s0, %s847_s23  ;;  %s1689_s15 = sld [smem:[#allocation21_spill]]  ;;  %vm1535_vm2 = vcmp.ne.s32.totalorder %v415_v38, 0  ;;  %vm1541_vm3 = vcmp.ne.s32.totalorder %v415_v38, 15 }
  0x7c   : > { %v1505_v4 = vld [vmem:[%s401_s12] sm:$0xf]  ;;  %p423_p3 = scmp.gt.s32.totalorder %s1212_s10, 0  ;;  %s391_s16 = sand.u32 1, %s1180_s25  }
  0x7d   : > { %442 = vrot.lane.b32.xlu1 %v1505_v4, %s1234_s21  ;;  %438 = vrot.lane.b32.xlu0 %v1505_v4, %s1235_s9  ;;  %s1690_s21 = sld [smem:[#allocation22_spill]]  ;;  %s845_s12 = sshll.u32 %s391_s16, 3 }
  0x7e   : > { %s424_s9 = scalar_select %p423_p3, 1.0, 0.0 }
  0x7f   : > { %s426_s17 = scalar_select %p396_p12, 1.0, 0.0 }
  0x80   : > { %v521_v13 = vld [vmem:[%s1688_s1] sm:$0xf]  ;;  %v433_v18 = vstv %s424_s9  ;;  %s849_s18 = sshll.u32 %s1216_s11, 1  ;;  %s1695_s30 = sld [smem:[#allocation23_spill]] }
  0x81   : > { %462 = vperm.xlu1 %998, %v453_v5   ;;  %456 = vperm.xlu0 %997, %v453_v5   ;;  %v665_v14 = vld [vmem:[%s1689_s15] sm:$0xff]  ;;  %v435_v23 = vstv %s426_s17  ;;  %s697_s6 = sadd.s32 %s1212_s10, %s849_s18  ;;  %s686_s27 = scalar_lea.sflag [#allocation4], %s391_s16 }
  0x82   : > { %p1697_p8 = scmp.ne.s32.totalorder %s1672_s19, 0  ;;  %s1245_s10 = smov [#allocation7]  }
  0x83   : > { %v672_v15 = vld [vmem:[%s1690_s21] sm:$0xff]  ;;  %s1080_s11 = sshll.u32 %s1245_s10, 4  ;;  %s1081_s11 = int_to_ptr.vmem [resolvable:$false] %s1080_s11 }
  0x84   : > { %s1082_s21 = scalar_lea.vmem %s1081_s11, 256 }
  0x85   : > { %999 = vset.pattern.permute.xlu1 %v1236_v6  ;;  %473 = vrot.lane.b32.xlu0 %v1505_v4, %s1237_s4 }
  0x86   : > { %468 = vperm.xlu1 %999, %v453_v5   ;;  %1003 = vset.pattern.permute.xlu0 %v1238_v7  ;;  %s1696_s15 = smov %s1695_s30 }
  0x89   : > { %504 = vperm.xlu0 %1003, %v453_v5  }
  0x8a   : > { %1000 = vset.pattern.permute.xlu1 %v1239_v8 }
  0x8b   : > { %480 = vperm.xlu1 %1000, %v453_v5  }
  0x8d   : > { %1007 = vset.pattern.permute.xlu0 %v1232_v0 }
  0x8f   : > { %1001 = vset.pattern.permute.xlu1 %v1240_v9 }
  0x90   : > { %486 = vperm.xlu1 %1001, %v453_v5  }
  0x94   : > { %1002 = vset.pattern.permute.xlu1 %v1241_v10 }
  0x95   : > { %492 = vperm.xlu1 %1002, %v453_v5  }
  0x99   : > { %476 = vrot.lane.b32.xlu1 %v1505_v4, %s1242_s20 }
  0x9a   : > { %1004 = vset.pattern.permute.xlu1 %v1243_v11 }
  0x9d   : > { %510 = vperm.xlu1 %1004, %v453_v5  }
  0xa1   : > { %1005 = vset.pattern.permute.xlu1 %v1244_v12 }
  0xa2   : > { %516 = vperm.xlu1 %1005, %v453_v5  }
  0xa6   : > { %1006 = vset.pattern.permute.xlu1 %v1233_v1 }
  0xa7   : > { %524 = vperm.xlu1 %1006, %v521_v13  }
  0xab   : > { %1008 = vset.pattern.permute.xlu1 %v1236_v6 }
  0xac   : > { %555 = vperm.xlu1 %1008, %v521_v13  }
  0xb0   : > { %1009 = vset.pattern.permute.xlu1 %v1239_v8 }
  0xb1   : > { %570 = vperm.xlu1 %1009, %v521_v13  }
  0xb5   : > { %1011 = vset.pattern.permute.xlu1 %v1241_v10 }
  0xb6   : > { %600 = vperm.xlu1 %1011, %v521_v13  }
  0xba   : > { %1012 = vset.pattern.permute.xlu1 %v1238_v7 }
  0xbb   : > { %615 = vperm.xlu1 %1012, %v521_v13  }
  0xbf   : > { %1014 = vset.pattern.permute.xlu1 %v1233_v1 }
  0xc0   : > { %668 = vperm.xlu1 %1014, %v665_v14  }
  0xc4   : > { %675 = vperm.xlu1 %1014, %v672_v15  }
  0xe8   : > { %v430_v19 = vpop.permute.xlu0 %429  ;;  %v432_v24 = vpop.permute.xlu1 %431 }
  0xe9   : > { %v434_v20 = vmul.f32 %v433_v18, %v430_v19  ;;  %v436_v25 = vmul.f32 %v435_v23, %v432_v24 }
  0xef   : > { %v439_v21 = vpop.permute.xlu0 %438  ;;  %v443_v26 = vpop.permute.xlu1 %442 }
  0xf0   : > { %v440_v22 = vsel %vm437_vm0, %v434_v20, %v439_v21  ;;  %v444_v27 = vsel %vm441_vm1, %v436_v25, %v443_v26 }
  0xf1   : > { %447 = vrot.lane.b32.xlu0 %v440_v22, %s1237_s4 }
  0xf5   : > { %450 = vrot.lane.b32.xlu0 %v440_v22, %s1242_s20 }
  0xf9   : > { %540 = vperm.xlu0 %1007, %v521_v13  }
  0xfc   : > { %v463_v28 = vpop.permute.xlu1 %462  ;;  %v457_v33 = vpop.permute.xlu0 %456 }
  0xfd   : > { %497 = vrot.lane.b32.xlu0 %v444_v27, %s1237_s4  ;;  %v465_v43 = vmul.f32 %v463_v28, %v440_v22  ;;  %s850_s4 = sshll.u32 %s697_s6, 7 }
  0xfe   : > { %1010 = vset.pattern.permute.xlu0 %v1240_v9  ;;  %s699_s26 = scalar_lea.hbm %s1695_s30, %s850_s4 }
 0x100   : > { %v474_v35 = vpop.permute.xlu0 %473 }
 0x101   : > { %500 = vrot.lane.b32.xlu0 %v444_v27, %s1242_s20  ;;  %v469_v29 = vpop.permute.xlu1 %468  ;;  %v475_v49 = vsel %vm1535_vm2, %v474_v35, 0.0  ;;  %s393_s20 = scalar_lea.vmem [#allocation7], %s845_s12 }
 0x102   : > { %s701_s7 = sshll.u32 %s393_s20, 4  ;;  %s702_s7 = int_to_ptr.vmem [resolvable:$true] %s701_s7 }
 0x103   : > { %s1076_s23 = scalar_lea.vmem %s702_s7, 128  ;;  %p1083_p9 = scmp.lt.s32.totalorder %s702_s7, %s1081_s11 }
 0x104   : > { %v505_v37 = vpop.permute.xlu0 %504  ;;  %p1077_p6 = scmp.ne.s32.totalorder %s702_s7, %s1076_s23  ;;  %p1084_p10 = scmp.lt.s32.totalorder %s1082_s21, %s1076_s23 }
 0x105   : > { %585 = vperm.xlu0 %1010, %v521_v13  }
 0x106   : > { %v481_v30 = vpop.permute.xlu1 %480  ;;  %p1078_p13 = pnand %p1077_p6, %p1697_p8  ;;  %p1085_p11 = por %p1084_p10, %p1083_p9 }
 0x107   : > { %v483_v52 = vmul.f32 %v481_v30, %v475_v49 }
 0x108   : > { %p1079_p1 = pneg %p1078_p13 }
 0x109   : > { %1013 = vset.pattern.permute.xlu0 %v1243_v11 }
 0x10a   : > { %630 = vperm.xlu0 %1013, %v521_v13   ;;  %p1086_p4 = pnand %p1085_p11, %p1079_p1 }
 0x10b   : > { %v487_v31 = vpop.permute.xlu1 %486 }
 0x10c   : > { %v489_v55 = vmul.f32 %v487_v31, %v1505_v4 }
 0x10e   : > { %1015 = vset.pattern.permute.xlu0 %v1233_v1 }
 0x110   : > { %v493_v32 = vpop.permute.xlu1 %492 }
 0x114   : > { %v477_v34 = vpop.permute.xlu1 %476 }
 0x115   : > { %v478_v54 = vsel %vm1541_vm3, %v477_v34, 0.0 }
 0x116   : > { %v495_v58 = vmul.f32 %v493_v32, %v478_v54 }
 0x118   : > { %v511_v36 = vpop.permute.xlu1 %510 }
 0x119   : > { %v513_v3 = vmul.f32 %v511_v36, %v444_v27 }
 0x11d   : > { %v517_v39 = vpop.permute.xlu1 %516 }
 0x122   : > { %v525_v48 = vpop.permute.xlu1 %524 }
 0x127   : > { %v556_v57 = vpop.permute.xlu1 %555 }
 0x12c   : > { %v571_v61 = vpop.permute.xlu1 %570 }
 0x131   : > { %v601_v1 = vpop.permute.xlu1 %600 }
 0x136   : > { %v616_v9 = vpop.permute.xlu1 %615 }
 0x163   : > { %v448_v41 = vpop.permute.xlu0 %447 }
 0x164   : > { %v449_v42 = vsel %vm1535_vm2, %v448_v41, 0.0 }
 0x165   : > { %v459_v44 = vmul.f32 %v457_v33, %v449_v42 }
 0x167   : > { %v466_v46 = vadd.f32 %v465_v43, %v459_v44  ;;  %v451_v47 = vpop.permute.xlu0 %450 }
 0x168   : > { %v452_v50 = vsel %vm1541_vm3, %v451_v47, 0.0 }
 0x169   : > { %v471_v51 = vmul.f32 %v469_v29, %v452_v50 }
 0x16b   : > { %v472_v53 = vadd.f32 %v471_v51, %v466_v46 }
 0x16d   : > { %v484_v56 = vadd.f32 %v483_v52, %v472_v53 }
 0x16f   : > { %v490_v59 = vadd.f32 %v489_v55, %v484_v56 }
 0x171   : > { %v496_v60 = vadd.f32 %v495_v58, %v490_v59 }
 0x174   : > { %v541_v62 = vpop.permute.xlu0 %540 }
 0x178   : > { %v498_v63 = vpop.permute.xlu0 %497 }
 0x179   : > { %v499_v0 = vsel %vm1535_vm2, %v498_v63, 0.0 }
 0x17a   : > { %v507_v2 = vmul.f32 %v505_v37, %v499_v0 }
 0x17c   : > { %v508_v5 = vadd.f32 %v507_v2, %v496_v60  ;;  %v501_v6 = vpop.permute.xlu0 %500 }
 0x17d   : > { %v502_v7 = vsel %vm1541_vm3, %v501_v6, 0.0 }
 0x17e   : > { %v514_v4 = vadd.f32 %v513_v3, %v508_v5  ;;  %v519_v8 = vmul.f32 %v517_v39, %v502_v7 }
 0x180   : > { %v520_v10 = vadd.f32 %v519_v8, %v514_v4  ;;  %v586_v11 = vpop.permute.xlu0 %585 }
 0x182   : > { %v603_v12 = vmul.f32 %v601_v1, %v520_v10  ;;  %v618_v13 = vmul.f32 %v616_v9, %v520_v10  ;;  %v527_v14 = vmul.f32 %v525_v48, %v520_v10  ;;  %v543_v15 = vmul.f32 %v541_v62, %v520_v10 }
 0x183   : > { %v558_v16 = vmul.f32 %v556_v57, %v520_v10  ;;  %v573_v17 = vmul.f32 %v571_v61, %v520_v10  ;;  %v588_v18 = vmul.f32 %v586_v11, %v520_v10 }
 0x184   : > { %v604_v19 = vsel %vm528_vm4, %v603_v12, 0.0  ;;  %v619_v20 = vsel %vm528_vm4, %v618_v13, 0.0  ;;  %v529_v21 = vsel %vm528_vm4, %v527_v14, 0.0  ;;  %v544_v22 = vsel %vm528_vm4, %v543_v15, 0.0 }
 0x185   : > { %v605_v23 = vrot.slane %v604_v19, 4  ;;  %v620_v24 = vrot.slane %v619_v20, 4  ;;  %v530_v25 = vrot.slane %v529_v21, 4  ;;  %v545_v26 = vrot.slane %v544_v22, 4  ;;  %v631_v27 = vpop.permute.xlu0 %630 }
 0x186   : > { %v559_v28 = vsel %vm528_vm4, %v558_v16, 0.0  ;;  %v574_v29 = vsel %vm528_vm4, %v573_v17, 0.0  ;;  %v589_v30 = vsel %vm528_vm4, %v588_v18, 0.0  ;;  %v633_v31 = vmul.f32 %v631_v27, %v520_v10 }
 0x187   : > { %v606_v32 = vadd.f32 %v605_v23, %v604_v19  ;;  %v621_v33 = vadd.f32 %v620_v24, %v619_v20  ;;  %v531_v34 = vadd.f32 %v530_v25, %v529_v21  ;;  %v546_v35 = vadd.f32 %v545_v26, %v544_v22 }
 0x188   : > { %v560_v36 = vrot.slane %v559_v28, 4  ;;  %v575_v37 = vrot.slane %v574_v29, 4  ;;  %v590_v38 = vrot.slane %v589_v30, 4  ;;  %v634_v39 = vsel %vm528_vm4, %v633_v31, 0.0 }
 0x189   : > { %v607_v40 = vrot.slane %v606_v32, 2  ;;  %v532_v41 = vrot.slane %v531_v34, 2  ;;  %v547_v42 = vrot.slane %v546_v35, 2  ;;  %v635_v46 = vrot.slane %v634_v39, 4 }
 0x18a   : > { %v561_v43 = vadd.f32 %v560_v36, %v559_v28  ;;  %v576_v44 = vadd.f32 %v575_v37, %v574_v29  ;;  %v591_v45 = vadd.f32 %v590_v38, %v589_v30  ;;  %v622_v47 = vrot.slane %v621_v33, 2 }
 0x18b   : > { %v533_v48 = vadd.f32 %v532_v41, %v531_v34  ;;  %v548_v49 = vadd.f32 %v547_v42, %v546_v35  ;;  %v636_v53 = vadd.f32 %v635_v46, %v634_v39  ;;  %v608_v54 = vadd.f32 %v607_v40, %v606_v32  ;;  %v669_v46 = vpop.permute.xlu1 %668 }
 0x18c   : > { %v562_v50 = vrot.slane %v561_v43, 2  ;;  %v577_v51 = vrot.slane %v576_v44, 2  ;;  %v592_v52 = vrot.slane %v591_v45, 2  ;;  %v623_v61 = vadd.f32 %v622_v47, %v621_v33 }
 0x18d   : > { %v534_v55 = vrot.slane %v533_v48, 1  ;;  %v549_v56 = vrot.slane %v548_v49, 1  ;;  %v637_v60 = vrot.slane %v636_v53, 2  ;;  %v609_v3 = vrot.slane %v608_v54, 1 }
 0x18e   : > { %v563_v57 = vadd.f32 %v562_v50, %v561_v43  ;;  %v578_v58 = vadd.f32 %v577_v51, %v576_v44  ;;  %v593_v59 = vadd.f32 %v592_v52, %v591_v45  ;;  %v624_v10 = vrot.slane %v623_v61, 1 }
 0x18f   : > { %v535_v62 = vadd.f32 %v534_v55, %v533_v48  ;;  %v550_v63 = vadd.f32 %v549_v56, %v548_v49  ;;  %v638_v9 = vadd.f32 %v637_v60, %v636_v53  ;;  %v610_v15 = vadd.f32 %v609_v3, %v608_v54  ;;  %v676_v52 = vpop.permute.xlu1 %675 }
 0x190   : > { %v564_v0 = vrot.slane %v563_v57, 1  ;;  %v579_v1 = vrot.slane %v578_v58, 1  ;;  %v594_v2 = vrot.slane %v593_v59, 1  ;;  %v625_v20 = vadd.f32 %v624_v10, %v623_v61 }
 0x191   : > { %v537_v5 = vmul.f32 %v535_v62, %v535_v62  ;;  %v551_v6 = vadd.f32 %v550_v63, %v535_v62  ;;  %v552_v7 = vmul.f32 %v550_v63, %v550_v63  ;;  %v639_v19 = vrot.slane %v638_v9, 1 }
 0x192   : > { %v565_v4 = vadd.f32 %v564_v0, %v563_v57  ;;  %v580_v8 = vadd.f32 %v579_v1, %v578_v58  ;;  %v595_v14 = vadd.f32 %v594_v2, %v593_v59  ;;  %v612_v24 = vmul.f32 %v610_v15, %v610_v15 }
 0x193   : > { %v553_v11 = vadd.f32 %v552_v7, %v537_v5  ;;  %v640_v26 = vadd.f32 %v639_v19, %v638_v9  ;;  %v627_v28 = vmul.f32 %v625_v20, %v625_v20  ;;  %v645_v36 = vsel %vm644_vm5, %v535_v62, %v550_v63 }
 0x194   : > { %v566_v12 = vadd.f32 %v565_v4, %v551_v6  ;;  %v567_v13 = vmul.f32 %v565_v4, %v565_v4  ;;  %v582_v18 = vmul.f32 %v580_v8, %v580_v8  ;;  %v597_v23 = vmul.f32 %v595_v14, %v595_v14 }
 0x195   : > { %v642_v31 = vmul.f32 %v640_v26, %v640_v26  ;;  %v647_v39 = vsel %vm646_vm6, %v645_v36, %v565_v4 }
 0x196   : > { %v568_v16 = vadd.f32 %v567_v13, %v553_v11  ;;  %v581_v17 = vadd.f32 %v580_v8, %v566_v12  ;;  %v649_v42 = vsel %vm648_vm7, %v647_v39, %v580_v8 }
 0x197   : > { %v650_v43 = vsel %vm528_vm4, %v649_v42, %v595_v14 }
 0x198   : > { %v583_v21 = vadd.f32 %v582_v18, %v568_v16  ;;  %v596_v22 = vadd.f32 %v595_v14, %v581_v17  ;;  %v652_v44 = vsel %vm651_vm8, %v650_v43, %v610_v15 }
 0x199   : > { %v654_v45 = vsel %vm653_vm9, %v652_v44, %v625_v20 }
 0x19a   : > { %v598_v25 = vadd.f32 %v597_v23, %v583_v21  ;;  %v611_v27 = vadd.f32 %v610_v15, %v596_v22  ;;  %v656_v47 = vsel %vm655_vm10, %v654_v45, %v640_v26 }
 0x19c   : > { %v613_v29 = vadd.f32 %v612_v24, %v598_v25  ;;  %v626_v30 = vadd.f32 %v625_v20, %v611_v27 }
 0x19e   : > { %v628_v32 = vadd.f32 %v627_v28, %v613_v29  ;;  %v641_v33 = vadd.f32 %v640_v26, %v626_v30 }
 0x1a0   : > { %v643_v34 = vadd.f32 %v642_v31, %v628_v32  ;;  %v657_v35 = vmul.f32 0.125, %v641_v33 }
 0x1a2   : > { %v658_v37 = vmul.f32 0.125, %v643_v34  ;;  %v659_v38 = vmul.f32 %v657_v35, %v657_v35  ;;  %v663_v48 = vsub.f32 %v656_v47, %v657_v35 }
 0x1a4   : > { %v660_v40 = vsub.f32 %v658_v37, %v659_v38 }
 0x1a6   : > { %v661_v41 = vadd.f32 1e-06, %v660_v40 }
 0x1a8   : > { %1016 = vrsqrt.f32 %v661_v41 }
 0x1b5   : > { %v1017_v49 = vpop.eup %1016 }
 0x1b6   : > { %v664_v50 = vmul.f32 %v1017_v49, %v663_v48 }
 0x1b8   : > { %v671_v51 = vmul.f32 %v669_v46, %v664_v50 }
 0x1ba   : > { %v678_v53 = vadd.f32 %v676_v52, %v671_v51 }
 0x1bc   : > { %v680_v54 = vmul.f32 0.70710677, %v678_v53  ;;  %v679_v56 = vmul.f32 0.5, %v678_v53 }
 0x1be   : > { %1018 = verf.f32 %v680_v54 }
 0x1cb   : > { %v1019_v55 = vpop.eup %1018 }
 0x1cc   : > { %v682_v57 = vadd.f32 1.0, %v1019_v55 }
 0x1ce   : > { %v683_v58 = vmul.f32 %v682_v57, %v679_v56 }
 0x1d0   : > { %684 = vst [vmem:[%s393_s20] sm:$0xff] %v683_v58 }
 0x1d1   : > { %1089 = shalt.err (!%p1086_p4)
}
 0x1d2   : > { %s1090_s9 = scalar_lea.hbm %s699_s26, 128  ;;  %s1094_s12 = scalar_lea.hbm %s1696_s15, 512 }
 0x1d3   : > { %p1091_p0 = scmp.ne.s32.totalorder %s699_s26, %s1090_s9  ;;  %p1095_p7 = scmp.lt.s32.totalorder %s699_s26, %s1696_s15 }
 0x1d4   : > { %p1096_p12 = scmp.lt.s32.totalorder %s1094_s12, %s1090_s9 }
 0x1d5   : > { %p1092_p5 = pnand %p1091_p0, %p1697_p8 }
 0x1d6   : > { %p1097_p3 = por %p1096_p12, %p1095_p7 }
 0x1d7   : > { %p1093_p2 = pneg %p1092_p5 }
 0x1d9   : > { %p1098_p6 = pnand %p1097_p3, %p1093_p2 }
 0x1db   : > { %1101 = shalt.err (!%p1098_p6)
}
 0x1dc   : > { %857 = dma.vmem_to_hbm [thread:$0]  (%p1697_p8), %s702_s7, 128, %s699_s26, %s686_s27  }
 0x1dd PF: > { %s1698_s4 = sld [smem:[#allocation18_spill]]  ;;  %p871_p13 = scmp.ge.s32.totalorder %s1228_s14, 2 }
 0x1de   : > { %s713_s20 = sand.u32 1, %s1176_s24  }
 0x1df   : > { %s714_s22 = scalar_lea.sflag [#allocation4], %s713_s20 }
 0x1e3   : > { %p1699_p1 = scmp.ne.s32.totalorder %s1698_s4, 0 }
 0x1e5   : > { %p867_p9 = pnand %p871_p13, %p1699_p1 }
 0x1e7   : > { %p868_p10 = pneg %p867_p9 }
 0x1e9   : > { %1167 = dma.done.wait (%p868_p10), %s714_s22, 128  }
 0x1ea   : > { %1169 = vsyncadd (%p868_p10), %s714_s22, 4294967168  ;;  %s26_s14 = sadd.s32 1, %s1228_s14   ;;  %s1701_s19 = sld [smem:[#allocation11_spill]] }
 0x1eb   : > { %p1588_p11 = scmp.ge.s32.totalorder %s26_s14, 6   ;;  %s1702_s26 = sld [smem:[#allocation17_spill]] }
 0x1ec   : > { %s1703_s7 = sld [smem:[#allocation12_spill]]  ;;  %s1708_s24 = smov %s1180_s25 }
 0x1ed   : > { %s1704_s9 = sld [smem:[#allocation16_spill]]  ;;  %s1710_s27 = smov %s1192_s28 }
 0x1ee   : > { %s1705_s10 = sld [smem:[#allocation13_spill]]  ;;  %s1711_s28 = smov %s1196_s29 }
 0x1ef   : > { %s1706_s12 = sld [smem:[#allocation14_spill]]  ;;  %s1712_s29 = smov %s1463_s5 }
 0x1f0   : > { %s1707_s23 = sld [smem:[#allocation15_spill]]  ;;  %s1709_s25 = smov %s1701_s19 }
 0x1f1   : > { %s1713_s30 = smov %s1204_s8  ;;  %s1715_s11 = smov %s1224_s13 }
 0x1f2   : > { %s1714_s8 = smov %s1703_s7  ;;  %25 = sbr.rel (!%p1588_p11) target bundleno = 18 (0x12), region = 109 }
 0x1f6   : > { %s1716_s13 = smov %s1707_s23 }
 0x1f7   :  { %719 = vsyncpa [#allocation3], 1 }
 0x1f8   :  { %721 = vsyncpa [#allocation3 + $0x1], 1 }
 0x1f9   :  { %722 = vsyncpa [#allocation6], 1 }
 0x1fa   :  { %724 = vsyncpa [#allocation6 + $0x1], 1 }
 0x1fb   :  { %725 = vsyncpa [#allocation4], 1 }
 0x1fc   :  { %727 = vsyncpa [#allocation4 + $0x1], 1 }

</bundles_post_ra>
